<compile_context>
chip_gen: v5e
topology: v5e:2x2
jax: 0.10.0
libtpu: 0.0.40
codegen_flags: <defaults>
</compile_context>

<pallas_src>
import jax
import jax.numpy as jnp
from jax.experimental import pallas as pl
from jax.experimental.pallas import tpu as pltpu


def _round_up(n, m):
    return ((n + m - 1) // m) * m


def _round_down(n, m):
    return (n // m) * m


def _discriminator_kernel(x_ref, w1_ref, b1_ref, w2_ref, b2_ref, w3_ref, b3_ref,
                          o_ref):
    # x tile: stream dtype is whatever the producer gave us; cast to bf16 only
    # for the MXU (trace-time branch, zero cost if x is already bf16).
    x = x_ref[...]
    if x.dtype != jnp.bfloat16:
        x = x.astype(jnp.bfloat16)

    # Layer 1: Linear(input_dim, 128) + ReLU  (bf16 MXU, f32 accumulate).
    # w1/w2 arrive pre-cast to bf16 -> no per-step weight converts.
    h1 = jnp.dot(x, w1_ref[...], preferred_element_type=jnp.float32) + b1_ref[...]
    h1 = jnp.maximum(h1, 0.0)

    # Layer 2: Linear(128, 128) + ReLU.
    h2 = jnp.dot(h1.astype(jnp.bfloat16), w2_ref[...],
                 preferred_element_type=jnp.float32) + b2_ref[...]
    h2 = jnp.maximum(h2, 0.0)

    # Layer 3: Linear(128, 1) as VPU multiply + lane reduction (XLU); w3 is the
    # (1, 128) f32 weight row broadcast over the batch tile.
    z = jnp.sum(h2 * w3_ref[...], axis=-1, keepdims=True) + b3_ref[...]

    # Sigmoid: exp on EUP, exact reciprocal (tiny (TM,1) column -> negligible).
    o_ref[...] = pl.reciprocal(1.0 + jnp.exp(-z), approx=False).astype(o_ref.dtype)


def _choose_tiling(B, D, x_itemsize):
    """Pick (grid_steps, TM).

    Budget the streamed-x double buffer at ~8 MiB so the kernel fits v5e's
    16 MiB scoped-VMEM default with headroom (bf16 weights + biases are
    < 0.5 MiB even for D=4096).  Then choose the step count first and derive
    TM from it so tail padding is bounded by ~16 rows per step.
    """
    x_buffer_budget = 8 * 1024 * 1024
    tm_cap = x_buffer_budget // (2 * max(D, 1) * x_itemsize)
    tm_cap = max(256, min(2048, _round_down(tm_cap, 16)))

    g = pl.cdiv(B, tm_cap)
    if B > 16:
        # v7x has 2 TensorCores: guarantee an even grid of >= 2 parallel steps
        # so both get batch work.  No-op cost on 1-TC v5e/v6e.
        g = max(2, g)
        g += g % 2
    tm = _round_up(pl.cdiv(B, g), 16)   # multiple of 16: bf16 (16,128) tile safe
    return g, tm


def discriminator_forward(x, params):
    """x: (B, input_dim) float32 or bfloat16; params: dict of w1,b1,w2,b2,w3,b3.

    w1: (D,128)  b1: (1,128)  w2: (128,128)  b2: (1,128)  w3: (1,128)  b3: (1,1)
    Returns (B, 1) float32 sigmoid outputs.
    """
    B, D = x.shape

    # Hoisted one-time casts: bf16 matmul weights, f32 everything else.
    w1 = params["w1"].astype(jnp.bfloat16)
    w2 = params["w2"].astype(jnp.bfloat16)
    b1 = params["b1"].astype(jnp.float32)
    b2 = params["b2"].astype(jnp.float32)
    w3 = params["w3"].astype(jnp.float32)
    b3 = params["b3"].astype(jnp.float32)

    g, TM = _choose_tiling(B, D, x.dtype.itemsize)
    Bp = g * TM
    if Bp != B:
        x = jnp.pad(x, ((0, Bp - B), (0, 0)))   # ragged tail -> zero padding

    const2 = lambda i: (0, 0)   # resident weights/biases: same block every step

    flops = 2 * Bp * (D * 128 + 128 * 128 + 128)
    bytes_accessed = (x.dtype.itemsize * Bp * D + 4 * Bp
                      + 2 * (D * 128 + 128 * 128)
                      + 4 * (128 + 128 + 128 + 1))

    out = pl.pallas_call(
        _discriminator_kernel,
        out_shape=jax.ShapeDtypeStruct((Bp, 1), jnp.float32),
        grid=(g,),
        in_specs=[
            pl.BlockSpec((TM, D), lambda i: (i, 0)),   # x: streamed over batch
            pl.BlockSpec(w1.shape, const2),
            pl.BlockSpec(b1.shape, const2),
            pl.BlockSpec(w2.shape, const2),
            pl.BlockSpec(b2.shape, const2),
            pl.BlockSpec(w3.shape, const2),
            pl.BlockSpec(b3.shape, const2),
        ],
        out_specs=pl.BlockSpec((TM, 1), lambda i: (i, 0)),
        compiler_params=pltpu.CompilerParams(
            dimension_semantics=("parallel",)),
        cost_estimate=pl.CostEstimate(flops=flops,
                                      transcendentals=Bp,
                                      bytes_accessed=bytes_accessed),
    )(x, w1, b1, w2, b2, w3, b3)

    return out[:B]


def init_params(key, input_dim):
    """nn.Linear-style init (uniform +/- 1/sqrt(fan_in)). Weights are stored as
    (in, out) for layers 1-2 and as a (1, 128) row for layer 3 (VPU path)."""
    ks = jax.random.split(key, 6)

    def uniform(k, shape, fan_in):
        bound = 1.0 / jnp.sqrt(fan_in)
        return jax.random.uniform(k, shape, jnp.float32, -bound, bound)

    w1 = uniform(ks[0], (input_dim, 128), input_dim)
    b1 = uniform(ks[1], (1, 128), input_dim)
    w2 = uniform(ks[2], (128, 128), 128)
    b2 = uniform(ks[3], (1, 128), 128)
    w3 = uniform(ks[4], (1, 128), 128)      # row form of the (128, 1) weight
    b3 = uniform(ks[5], (1, 1), 128)
    return {"w1": w1, "b1": b1, "w2": w2, "b2": b2, "w3": w3, "b3": b3}


def reference_forward(x, p):
    x = x.astype(jnp.float32)
    h1 = jnp.maximum(x @ p["w1"] + p["b1"], 0.0)
    h2 = jnp.maximum(h1 @ p["w2"] + p["b2"], 0.0)
    return jax.nn.sigmoid(h2 @ p["w3"].T + p["b3"])


if __name__ == "__main__":
    key = jax.random.PRNGKey(0)
    k_x, k_x2, k_p = jax.random.split(key, 3)

    input_dim = 32
    params = init_params(k_p, input_dim)

    # Small batch (single grid step, padded 8 -> 16 rows).
    x_small = jax.random.normal(k_x, (8, input_dim), jnp.float32)
    out_small = jax.block_until_ready(discriminator_forward(x_small, params))
    ref_small = reference_forward(x_small, params)
    assert out_small.shape == (8, 1)
    assert jnp.allclose(out_small, ref_small, atol=2e-2, rtol=2e-2)

    # Multi-step grid with a ragged tail (B=300 -> g=2, TM=160, 20 pad rows),
    # f32 streaming path.
    x_big = jax.random.normal(k_x2, (300, input_dim), jnp.float32)
    out_big = jax.block_until_ready(discriminator_forward(x_big, params))
    ref_big = reference_forward(x_big, params)
    assert out_big.shape == (300, 1)
    assert jnp.allclose(out_big, ref_big, atol=2e-2, rtol=2e-2)

    # bf16-producer path: x streamed as bf16 end-to-end (halves HBM read of x).
    x_bf16 = x_big.astype(jnp.bfloat16)
    out_bf16 = jax.block_until_ready(discriminator_forward(x_bf16, params))
    ref_bf16 = reference_forward(x_bf16, params)
    assert out_bf16.shape == (300, 1)
    assert jnp.allclose(out_bf16, ref_bf16, atol=2e-2, rtol=2e-2)

    print("KERNEL_OK")
</pallas_src>

<mosaic_0001>
module attributes {stable_mosaic.version = 11 : i64} {
  func.func @_discriminator_kernel(%arg0: i32, %arg1: memref<16x32xf32, #tpu.memory_space<vmem>>, %arg2: memref<32x128xbf16, #tpu.memory_space<vmem>>, %arg3: memref<1x128xf32, #tpu.memory_space<vmem>>, %arg4: memref<128x128xbf16, #tpu.memory_space<vmem>>, %arg5: memref<1x128xf32, #tpu.memory_space<vmem>>, %arg6: memref<1x128xf32, #tpu.memory_space<vmem>>, %arg7: memref<1x1xf32, #tpu.memory_space<vmem>>, %arg8: memref<16x1xf32, #tpu.memory_space<vmem>>) attributes {dimension_semantics = [#tpu.dimension_semantics<parallel>], iteration_bounds = array<i64: 1>, scalar_prefetch = 0 : i64, scratch_operands = 0 : i64, tpu.core_type = #tpu.core_type<tc>, window_params = [{transform_indices = @transform_0, window_bounds = array<i64: 16, 32>}, {pipeline_mode = #tpu.pipeline_mode<synchronous>, transform_indices = @transform_1, window_bounds = array<i64: 32, 128>}, {pipeline_mode = #tpu.pipeline_mode<synchronous>, transform_indices = @transform_2, window_bounds = array<i64: 1, 128>}, {pipeline_mode = #tpu.pipeline_mode<synchronous>, transform_indices = @transform_3, window_bounds = array<i64: 128, 128>}, {pipeline_mode = #tpu.pipeline_mode<synchronous>, transform_indices = @transform_4, window_bounds = array<i64: 1, 128>}, {pipeline_mode = #tpu.pipeline_mode<synchronous>, transform_indices = @transform_5, window_bounds = array<i64: 1, 128>}, {pipeline_mode = #tpu.pipeline_mode<synchronous>, transform_indices = @transform_6, window_bounds = array<i64: 1, 1>}, {transform_indices = @transform_7, window_bounds = array<i64: 16, 1>}]} {
    %c0 = arith.constant 0 : index
    %c0_0 = arith.constant 0 : index
    %0 = vector.load %arg1[%c0, %c0_0] : memref<16x32xf32, #tpu.memory_space<vmem>>, vector<16x32xf32>
    %1 = arith.truncf %0 : vector<16x32xf32> to vector<16x32xbf16>
    %c0_1 = arith.constant 0 : index
    %c0_2 = arith.constant 0 : index
    %2 = vector.load %arg2[%c0_1, %c0_2] : memref<32x128xbf16, #tpu.memory_space<vmem>>, vector<32x128xbf16>
    %cst = arith.constant dense<0.000000e+00> : vector<16x128xf32>
    %3 = tpu.matmul %1, %2, %cst {dimension_numbers = #tpu.dot_dimension_numbers<[1], [0], [0], [1], [0, 0, 1, 1], [], []>} : vector<16x32xbf16>, vector<32x128xbf16>, vector<16x128xf32> -> vector<16x128xf32>
    %c0_3 = arith.constant 0 : index
    %c0_4 = arith.constant 0 : index
    %4 = vector.load %arg3[%c0_3, %c0_4] : memref<1x128xf32, #tpu.memory_space<vmem>>, vector<1x128xf32>
    %5 = vector.broadcast %4 : vector<1x128xf32> to vector<16x128xf32>
    %6 = arith.addf %3, %5 : vector<16x128xf32>
    %cst_5 = arith.constant 0.000000e+00 : f32
    %7 = vector.broadcast %cst_5 : f32 to vector<16x128xf32>
    %8 = arith.maximumf %6, %7 : vector<16x128xf32>
    %9 = arith.truncf %8 : vector<16x128xf32> to vector<16x128xbf16>
    %c0_6 = arith.constant 0 : index
    %c0_7 = arith.constant 0 : index
    %10 = vector.load %arg4[%c0_6, %c0_7] : memref<128x128xbf16, #tpu.memory_space<vmem>>, vector<128x128xbf16>
    %cst_8 = arith.constant dense<0.000000e+00> : vector<16x128xf32>
    %11 = tpu.matmul %9, %10, %cst_8 {dimension_numbers = #tpu.dot_dimension_numbers<[1], [0], [0], [1], [0, 0, 1, 1], [], []>} : vector<16x128xbf16>, vector<128x128xbf16>, vector<16x128xf32> -> vector<16x128xf32>
    %c0_9 = arith.constant 0 : index
    %c0_10 = arith.constant 0 : index
    %12 = vector.load %arg5[%c0_9, %c0_10] : memref<1x128xf32, #tpu.memory_space<vmem>>, vector<1x128xf32>
    %13 = vector.broadcast %12 : vector<1x128xf32> to vector<16x128xf32>
    %14 = arith.addf %11, %13 : vector<16x128xf32>
    %cst_11 = arith.constant 0.000000e+00 : f32
    %15 = vector.broadcast %cst_11 : f32 to vector<16x128xf32>
    %16 = arith.maximumf %14, %15 : vector<16x128xf32>
    %c0_12 = arith.constant 0 : index
    %c0_13 = arith.constant 0 : index
    %17 = vector.load %arg6[%c0_12, %c0_13] : memref<1x128xf32, #tpu.memory_space<vmem>>, vector<1x128xf32>
    %18 = vector.broadcast %17 : vector<1x128xf32> to vector<16x128xf32>
    %19 = arith.mulf %16, %18 : vector<16x128xf32>
    %cst_14 = arith.constant dense<0.000000e+00> : vector<16xf32>
    %20 = vector.multi_reduction <add>, %19, %cst_14 [1] : vector<16x128xf32> to vector<16xf32>
    %21 = vector.shape_cast %20 : vector<16xf32> to vector<16x1xf32>
    %c0_15 = arith.constant 0 : index
    %c0_16 = arith.constant 0 : index
    %22 = vector.load %arg7[%c0_15, %c0_16] : memref<1x1xf32, #tpu.memory_space<vmem>>, vector<1x1xf32>
    %23 = vector.broadcast %22 : vector<1x1xf32> to vector<16x1xf32>
    %24 = arith.addf %21, %23 : vector<16x1xf32>
    %cst_17 = arith.constant 0.000000e+00 : f32
    %25 = vector.broadcast %cst_17 : f32 to vector<16x1xf32>
    %26 = arith.subf %25, %24 : vector<16x1xf32>
    %27 = math.exp %26 : vector<16x1xf32>
    %cst_18 = arith.constant 1.000000e+00 : f32
    %28 = vector.broadcast %cst_18 : f32 to vector<16x1xf32>
    %29 = arith.addf %28, %27 : vector<16x1xf32>
    %30 = tpu.reciprocal %29 : vector<16x1xf32> -> vector<16x1xf32>
    %c0_19 = arith.constant 0 : index
    %c0_20 = arith.constant 0 : index
    %31 = vector.load %arg8[%c0_19, %c0_20] : memref<16x1xf32, #tpu.memory_space<vmem>>, vector<16x1xf32>
    tpu.vector_store %arg8[%c0_19, %c0_20], %30 {strides = array<i32>} : memref<16x1xf32, #tpu.memory_space<vmem>>, vector<16x1xf32>,
    return
  }
  func.func @transform_0(%arg0: i32) -> (i32, i32) {
    %c0_i32 = arith.constant 0 : i32
    %c0_i32_0 = arith.constant 0 : i32
    return %arg0, %c0_i32 : i32, i32
  }
  func.func @transform_1(%arg0: i32) -> (i32, i32) {
    %c0_i32 = arith.constant 0 : i32
    %c0_i32_0 = arith.constant 0 : i32
    %c0_i32_1 = arith.constant 0 : i32
    return %c0_i32, %c0_i32_0 : i32, i32
  }
  func.func @transform_2(%arg0: i32) -> (i32, i32) {
    %c0_i32 = arith.constant 0 : i32
    %c0_i32_0 = arith.constant 0 : i32
    %c0_i32_1 = arith.constant 0 : i32
    return %c0_i32, %c0_i32_0 : i32, i32
  }
  func.func @transform_3(%arg0: i32) -> (i32, i32) {
    %c0_i32 = arith.constant 0 : i32
    %c0_i32_0 = arith.constant 0 : i32
    %c0_i32_1 = arith.constant 0 : i32
    return %c0_i32, %c0_i32_0 : i32, i32
  }
  func.func @transform_4(%arg0: i32) -> (i32, i32) {
    %c0_i32 = arith.constant 0 : i32
    %c0_i32_0 = arith.constant 0 : i32
    %c0_i32_1 = arith.constant 0 : i32
    return %c0_i32, %c0_i32_0 : i32, i32
  }
  func.func @transform_5(%arg0: i32) -> (i32, i32) {
    %c0_i32 = arith.constant 0 : i32
    %c0_i32_0 = arith.constant 0 : i32
    %c0_i32_1 = arith.constant 0 : i32
    return %c0_i32, %c0_i32_0 : i32, i32
  }
  func.func @transform_6(%arg0: i32) -> (i32, i32) {
    %c0_i32 = arith.constant 0 : i32
    %c0_i32_0 = arith.constant 0 : i32
    %c0_i32_1 = arith.constant 0 : i32
    return %c0_i32, %c0_i32_0 : i32, i32
  }
  func.func @transform_7(%arg0: i32) -> (i32, i32) {
    %c0_i32 = arith.constant 0 : i32
    %c0_i32_0 = arith.constant 0 : i32
    return %arg0, %c0_i32 : i32, i32
  }
}

</mosaic_0001>

<bundles_post_ra>
// kernel: tpu_custom_call.1
= control target key start
LH: loop header
LB: loop body
LE: loop exit
PB: predicated region body
PF: predicated region fallthrough
CT: control target
= control target key end

     0   :  { %s487_s0 = inlined_call_operand.hbm [shape: f32[16,32], index: 0, kind: input, shape index: {}]   ;;  %s488_s1 = inlined_call_operand.hbm [shape: bf16[32,128], index: 1, kind: input, shape index: {}]   ;;  %s489_s2 = inlined_call_operand.vmem [shape: f32[1,128], index: 2, kind: input, shape index: {}]   ;;  %s490_s3 = inlined_call_operand.hbm [shape: bf16[128,128], index: 3, kind: input, shape index: {}]   ;;  %s491_s4 = inlined_call_operand.vmem [shape: f32[1,128], index: 4, kind: input, shape index: {}]   ;;  %s492_s5 = inlined_call_operand.vmem [shape: f32[1,128], index: 5, kind: input, shape index: {}]   ;;  %s493_s6 = inlined_call_operand.<no memory space> [shape: f32[1,1], index: 6, kind: input, shape index: {}]   ;;  %s494_s7 = inlined_call_operand.vmem [shape: f32[16,1], index: 7, kind: output, shape index: {}]  }
   0x1   :  { %v12_v0 = vstv %s493_s6 }
   0x2   :  { %13 = vst [vmem:[#allocation2] sm:$0x1] %v12_v0 }
   0x3   :  { %14 = vsyncpa [#allocation4], 0 }
   0x4   :  { %15 = vsyncpa [#allocation6], 0  ;;  %s33_s28 = sshll.u32 %s488_s1, 4  ;;  %s411_s29 = smov [#allocation5]   ;;  %s34_s28 = int_to_ptr.hbm [resolvable:$true] %s33_s28 }
   0x5   :  { %s35_s30 = sshll.u32 %s411_s29, 4  ;;  %s20_s10 = sshll.u32 %s487_s0, 4  ;;  %s36_s30 = int_to_ptr.vmem [resolvable:$true] %s35_s30  ;;  %s21_s10 = int_to_ptr.hbm [resolvable:$true] %s20_s10 }
   0x6   :  { %s412_s11 = smov 64   ;;  %s413_s12 = smov 4  }
   0x7   :  { %41 = dma.hbm_to_vmem [thread:$0]  %s34_s28, 256, %s36_s30, [#allocation6], %s412_s11, %s412_s11, %s413_s12  }
   0x8   :  { %s414_s6 = smov [#allocation3]   ;;  %s415_s14 = smov 128  }
   0x9   :  { %s22_s13 = sshll.u32 %s414_s6, 4  ;;  %s416_s15 = smov 8   ;;  %s23_s13 = int_to_ptr.vmem [resolvable:$true] %s22_s13 }
   0xa   :  { %28 = dma.hbm_to_vmem [thread:$0]  %s21_s10, 256, %s23_s13, [#allocation4], %s415_s14, %s415_s14, %s416_s15  }
   0xb   :  { %s48_s17 = sshll.u32 %s490_s3, 4  ;;  %s417_s18 = smov [#allocation7]   ;;  %s49_s17 = int_to_ptr.hbm [resolvable:$true] %s48_s17 }
   0xc   :  { %s50_s19 = sshll.u32 %s417_s18, 4  ;;  %s51_s19 = int_to_ptr.vmem [resolvable:$true] %s50_s19 }
   0xd   :  { %56 = dma.hbm_to_vmem [thread:$0]  %s49_s17, 1024, %s51_s19, [#allocation6], %s412_s11, %s412_s11, %s413_s12  }
   0xe   :  { %407 = dma.done.wait [#allocation4], 256  }
   0xf   :  { %408 = vsyncadd [#allocation4], 4294967040 }
  0x10   :  { %409 = dma.done.wait [#allocation6], 1280  }
  0x11   :  { %410 = vsyncadd [#allocation6], 4294966016  ;;  %v307_v1 = vld [vmem:[#allocation5 + $0x8] sm:$0xff]  ;;  %v306_v2 = vld [vmem:[#allocation5] sm:$0xff]  ;;  %vm99_vm0 = vcmask 261120   ;;  %vm256_vm3 = vcmask 7168  }
  0x12   :  { %v315_v3 = vld [vmem:[#allocation7 + $0x38] sm:$0xff]  ;;  %109 = vmatpush.bf16.msra.mxu0 %v307_v1  ;;  %v76_v4 = vld [vmem:[#allocation3] sm:$0xff]  ;;  %v77_v5 = vld [vmem:[#allocation3 + $0x8] sm:$0xff] }
  0x13   :  { %188 = vmatpush.bf16.msra.mxu1 %v315_v3  ;;  %v314_v6 = vld [vmem:[#allocation7 + $0x30] sm:$0xff]  ;;  %v78_v7 = vpack.c.bf16 %v77_v5, %v76_v4  ;;  %v313_v8 = vld [vmem:[#allocation7 + $0x28] sm:$0xff]  ;;  %v312_v9 = vld [vmem:[#allocation7 + $0x20] sm:$0xff] }
  0x14   :  { %v311_v10 = vld [vmem:[#allocation7 + $0x18] sm:$0xff]  ;;  %v310_v11 = vld [vmem:[#allocation7 + $0x10] sm:$0xff]  ;;  %v309_v12 = vld [vmem:[#allocation7 + $0x8] sm:$0xff] }
  0x15   :  { %v308_v13 = vld [vmem:[#allocation7] sm:$0xff]  ;;  %v323_v15 = vld [vmem:[%s489_s2] ss:$0 sm:$0xff] }
  0x16   :  { %110 = vmatpush.bf16.msra.mxu0 %v306_v2  ;;  %v324_v22 = vld [vmem:[%s491_s4] ss:$0 sm:$0xff] }
  0x17   :  { %189 = vmatpush.bf16.msra.mxu1 %v314_v6  ;;  %v325_v25 = vld [vmem:[%s492_s5] ss:$0 sm:$0xff] }
  0x18   :  { %v326_v32 = vld [vmem:[#allocation2] ss:$0 sm:$0xff] }
  0x19   :  { %273 = vmatmul.msk.bf16.vlgmr.msra.gmra.mxu0 %vm99_vm0, %v78_v7 }
  0x1b   :  { %190 = vmatpush.bf16.msra.mxu1 %v313_v8 }
  0x1f   :  { %191 = vmatpush.bf16.msra.mxu1 %v312_v9 }
  0x23   :  { %192 = vmatpush.bf16.msra.mxu1 %v311_v10 }
  0x27   :  { %193 = vmatpush.bf16.msra.mxu1 %v310_v11 }
  0x2b   :  { %194 = vmatpush.bf16.msra.mxu1 %v309_v12 }
  0x2f   :  { %195 = vmatpush.bf16.msra.mxu1 %v308_v13 }
  0x96   :  { %v112_v14 = vpop.f32.mrf.mxu0 }
  0x97   :  { %v113_v16 = vadd.f32 %v323_v15, %v112_v14 }
  0x99   :  { %v117_v19 = vmax.f32 %v113_v16, 0.0 }
  0x9e   :  { %v114_v17 = vpop.f32.mrf.mxu0 }
  0x9f   :  { %v115_v18 = vadd.f32 %v323_v15, %v114_v17 }
  0xa1   :  { %v118_v20 = vmax.f32 %v115_v18, 0.0 }
  0xa3   :  { %v119_v21 = vpack.c.bf16 %v118_v20, %v117_v19 }
  0xa5   :  { %196 = vmatmul.bf16.vlgmr.msra.gmra.mxu1 %v119_v21 }
 0x122   :  { %v197_v23 = vpop.f32.mrf.mxu1 }
 0x123   :  { %v198_v24 = vadd.f32 %v324_v22, %v197_v23 }
 0x125   :  { %v202_v26 = vmax.f32 %v198_v24, 0.0 }
 0x127   :  { %v208_v27 = vmul.f32 %v325_v25, %v202_v26 }
 0x129   :  { %210 = vadd.xlane.f32.xlu0 %v208_v27 }
 0x12a   :  { %v199_v28 = vpop.f32.mrf.mxu1 }
 0x12b   :  { %v200_v29 = vadd.f32 %v324_v22, %v199_v28 }
 0x12d   :  { %v203_v30 = vmax.f32 %v200_v29, 0.0 }
 0x12f   :  { %v209_v31 = vmul.f32 %v325_v25, %v203_v30 }
 0x131   :  { %212 = vadd.xlane.f32.xlu0 %v209_v31 }
 0x19c   :  { %v211_v33 = vpop.xlane.xlu0 %210 }
 0x19d   :  { %v218_v34 = vadd.f32 %v326_v32, %v211_v33 }
 0x19f   :  { %v220_v35 = vsub.f32 0.0, %v218_v34 }
 0x1a1   :  { %v222_v36 = vmul.f32 1.442695, %v220_v35 }
 0x1a3   :  { %327 = vpow2.f32 %v222_v36 }
 0x1a4   :  { %v213_v37 = vpop.xlane.xlu0 %212 }
 0x1a5   :  { %v219_v38 = vadd.f32 %v326_v32, %v213_v37 }
 0x1a7   :  { %v221_v39 = vsub.f32 0.0, %v219_v38 }
 0x1a9   :  { %v328_v40 = vpop.eup %327  ;;  %v224_v41 = vmul.f32 1.442695, %v221_v39 }
 0x1aa   :  { %v226_v42 = vadd.f32 1.0, %v328_v40 }
 0x1ab   :  { %329 = vpow2.f32 %v224_v41 }
 0x1ac   :  { %331 = vrcp.f32 %v226_v42  ;;  %v239_v48 = vand.u32 2147483648, %v226_v42  ;;  %v237_v50 = vand.u32 2147483647, %v226_v42  ;;  %vm233_vm2 = vweird.f32 %v226_v42 }
 0x1ae   :  { %v240_v53 = vor.u32 1.1754944e-38, %v239_v48  ;;  %vm238_vm5 = vcmp.eq.f32.partialorder %v237_v50, 8.507059e+37 }
 0x1b1   :  { %v330_v43 = vpop.eup %329 }
 0x1b2   :  { %v332_v44 = vpop.eup %331  ;;  %v227_v45 = vadd.f32 1.0, %v330_v43 }
 0x1b3   :  { %v229_v46 = vmul.f32 %v332_v44, %v226_v42  ;;  %vm234_vm1 = vweird.f32 %v332_v44 }
 0x1b4   :  { %333 = vrcp.f32 %v227_v45  ;;  %vm235_vm4 = vmor %vm233_vm2, %vm234_vm1  ;;  %v253_v58 = vand.u32 2147483648, %v227_v45  ;;  %v251_v60 = vand.u32 2147483647, %v227_v45  ;;  %vm247_vm7 = vweird.f32 %v227_v45 }
 0x1b5   :  { %v230_v47 = vsub.f32 1.0, %v229_v46 }
 0x1b6   :  { %v254_v62 = vor.u32 1.1754944e-38, %v253_v58  ;;  %vm252_vm9 = vcmp.eq.f32.partialorder %v251_v60, 8.507059e+37 }
 0x1b7   :  { %v231_v49 = vmul.f32 %v332_v44, %v230_v47 }
 0x1b9   :  { %v232_v51 = vadd.f32 %v332_v44, %v231_v49 }
 0x1ba   :  { %v334_v52 = vpop.eup %333 }
 0x1bb   :  { %v236_v54 = vsel %vm235_vm4, %v332_v44, %v232_v51  ;;  %v243_v55 = vmul.f32 %v334_v52, %v227_v45  ;;  %vm248_vm6 = vweird.f32 %v334_v52 }
 0x1bc   :  { %v241_v56 = vsel %vm238_vm5, %v240_v53, %v236_v54  ;;  %vm249_vm8 = vmor %vm247_vm7, %vm248_vm6 }
 0x1bd   :  { %257 = vst.msk [vmem:[%s494_s7] sm:$0xff] %vm256_vm3, %v241_v56  ;;  %v244_v57 = vsub.f32 1.0, %v243_v55 }
 0x1bf   :  { %v245_v59 = vmul.f32 %v334_v52, %v244_v57 }
 0x1c1   :  { %v246_v61 = vadd.f32 %v334_v52, %v245_v59 }
 0x1c3   :  { %v250_v63 = vsel %vm249_vm8, %v334_v52, %v246_v61 }
 0x1c4   :  { %v255_v0 = vsel %vm252_vm9, %v254_v62, %v250_v63 }
 0x1c5   :  { %258 = vst.msk [vmem:[%s494_s7 + $0x8] sm:$0xff] %vm256_vm3, %v255_v0 }
 0x1c6   :  { %263 = vsyncpa [#allocation4], 1 }
 0x1c7   :  { %264 = vsyncpa [#allocation6], 1 }

</bundles_post_ra>
